<compile_context>
chip_gen: v5e
topology: v5e:2x2
jax: 0.10.0
libtpu: 0.0.40
codegen_flags: <defaults>
</compile_context>

<pallas_src>
import functools
import math

import jax
import jax.numpy as jnp
from jax.experimental import pallas as pl
from jax.experimental.pallas import tpu as pltpu


def _round_up(x: int, m: int) -> int:
    return (x + m - 1) // m * m


def _mlp_kernel(*refs, num_layers: int, sigmoid: bool):
    """Fused MLP on one batch tile: (Linear -> ReLU)*(L-1) -> Linear [-> sigmoid].

    refs layout: x_ref, (w_ref, b_ref) * num_layers, o_ref.
    Weights are bf16 (MXU inputs); biases, accumulation and activations are f32.
    """
    x_ref = refs[0]
    o_ref = refs[-1]
    params = refs[1:-1]

    # Cast to bf16 in-kernel (VPU) instead of a separate XLA convert pass in HBM.
    h = x_ref[...].astype(jnp.bfloat16)                       # (bt, in_p) bf16
    for i in range(num_layers):
        w_ref = params[2 * i]
        b_ref = params[2 * i + 1]
        # MXU bf16 matmul, f32 accumulation.
        acc = jnp.dot(h, w_ref[...], preferred_element_type=jnp.float32)
        acc = acc + b_ref[...]                                # f32 bias add (VPU)
        if i < num_layers - 1:
            h = jnp.maximum(acc, 0.0).astype(jnp.bfloat16)    # ReLU, back to bf16
        else:
            h = acc                                           # final layer stays f32
    if sigmoid:
        # Clamp so exp never overflows; reciprocal goes to the EUP slot.
        h = pl.reciprocal(1.0 + jnp.exp(-jnp.clip(h, -30.0, 30.0)), approx=True)
    o_ref[...] = h.astype(o_ref.dtype)


def _resident_spec(shape):
    """Grid-invariant operand: constant index_map + single buffering."""
    def origin(i):
        return (0, 0)
    if hasattr(pl, "Buffered"):
        try:
            return pl.BlockSpec(shape, origin, pipeline_mode=pl.Buffered(1))
        except TypeError:
            pass  # older jax without pipeline_mode kwarg
    return pl.BlockSpec(shape, origin)


def mlp_forward(x, weights, biases, *, sigmoid: bool, batch_tile=None, out_dtype=None):
    """Run the fused MLP Pallas kernel.

    :param x: (batch, input_dim) array (f32 or bf16; cast to bf16 in-kernel).
    :param weights: list of (in_dim, out_dim) float32 arrays.
    :param biases: list of (1, out_dim) float32 arrays.
    :param sigmoid: apply sigmoid to the output (inference-mode semantics).
    :param batch_tile: rows per grid step (rounded up to a multiple of 16).
    :param out_dtype: output dtype; defaults to bf16 when sigmoid (values in [0,1])
                      else f32.
    """
    num_layers = len(weights)
    batch, input_dim = x.shape
    output_dim = weights[-1].shape[1]

    if out_dtype is None:
        out_dtype = jnp.bfloat16 if sigmoid else jnp.float32

    # Lane-dense padding: every feature dim -> multiple of 128.
    dims_p = [_round_up(input_dim, 128)]
    for w in weights:
        dims_p.append(_round_up(w.shape[1], 128))
    in_p, out_p = dims_p[0], dims_p[-1]

    # Batch tiling: multiple of 16 (bf16 sublane packing).  Pick the tile so
    # dead-row padding is minimal while keeping >= 2 grid steps when possible
    # (both v7x TensorCores get work) and ~512 rows per step to amortize the
    # ~0.35 us per-grid-step overhead.
    if batch_tile is None:
        n_steps = max(pl.cdiv(batch, 512), 2 if batch >= 32 else 1)
        batch_tile = _round_up(pl.cdiv(batch, n_steps), 16)
    batch_tile = max(16, _round_up(int(batch_tile), 16))
    batch_p = _round_up(batch, batch_tile)

    # Pad X only if actually needed; keep its dtype (kernel casts to bf16).
    # Zero padding is exact: padded input columns meet zero weight rows, so the
    # valid output columns are unchanged; padded batch rows are sliced off.
    if (batch_p, in_p) != (batch, input_dim):
        x_in = jnp.pad(x, ((0, batch_p - batch), (0, in_p - input_dim)))
    else:
        x_in = x

    weights_p, biases_p = [], []
    for i in range(num_layers):
        w, b = weights[i], biases[i]
        wp = jnp.pad(w, ((0, dims_p[i] - w.shape[0]), (0, dims_p[i + 1] - w.shape[1])))
        bp = jnp.pad(b, ((0, 0), (0, dims_p[i + 1] - b.shape[1])))
        weights_p.append(wp.astype(jnp.bfloat16))
        biases_p.append(bp.astype(jnp.float32))

    operands = [x_in]
    in_specs = [pl.BlockSpec((batch_tile, in_p), lambda i: (i, 0))]
    for wp, bp in zip(weights_p, biases_p):
        operands.append(wp)
        operands.append(bp)
        in_specs.append(_resident_spec(wp.shape))   # VMEM-resident across steps
        in_specs.append(_resident_spec(bp.shape))

    # Explicit VMEM budget: double-buffered X/out tiles + single-buffered
    # weights/biases + f32 activation/accumulator headroom.  Never below the
    # default scoped limit; capped at 64 MiB so it is also valid on v7x.
    x_itemsize = jnp.dtype(x_in.dtype).itemsize
    out_itemsize = jnp.dtype(out_dtype).itemsize
    vmem_need = (
        2 * batch_tile * in_p * x_itemsize
        + 2 * batch_tile * out_p * out_itemsize
        + sum(int(w.size) * 2 for w in weights_p)
        + sum(int(b.size) * 4 for b in biases_p)
        + 4 * batch_tile * max(dims_p) * 4
    )
    vmem_limit = min(max(int(vmem_need * 1.25) + (4 << 20), 32 << 20), 64 << 20)
    # TODO(synk): if padded bf16 weights ever approach ~20-30 MiB (deep/wide MLP
    # on v7x), switch to tiling the output-feature dim as a second grid axis.

    kernel = functools.partial(_mlp_kernel, num_layers=num_layers, sigmoid=sigmoid)

    out = pl.pallas_call(
        kernel,
        out_shape=jax.ShapeDtypeStruct((batch_p, out_p), out_dtype),
        grid=(batch_p // batch_tile,),
        in_specs=in_specs,
        out_specs=pl.BlockSpec((batch_tile, out_p), lambda i: (i, 0)),
        compiler_params=pltpu.CompilerParams(
            dimension_semantics=("parallel",),      # batch steps shard across TCs
            vmem_limit_bytes=vmem_limit,
        ),
    )(*operands)

    # TODO(synk): throughput-critical consumers can read the padded
    # (batch_p, out_p) array directly (cols [:output_dim]) and skip this slice.
    return out[:batch, :output_dim]


def init_mlp_params(key, input_dim, hidden_dim, output_dim, num_layers):
    """Deterministic init mimicking torch.nn.Linear's U(-1/sqrt(fan_in), 1/sqrt(fan_in))."""
    assert num_layers > 1
    layer_dims = [input_dim] + [hidden_dim] * (num_layers - 1) + [output_dim]
    weights, biases = [], []
    for i in range(len(layer_dims) - 1):
        fan_in, fan_out = layer_dims[i], layer_dims[i + 1]
        key, kw, kb = jax.random.split(key, 3)
        bound = 1.0 / math.sqrt(fan_in)
        # stored as (in_dim, out_dim), i.e. torch weight (out, in) transposed
        w = jax.random.uniform(kw, (fan_in, fan_out), jnp.float32, -bound, bound)
        b = jax.random.uniform(kb, (1, fan_out), jnp.float32, -bound, bound)
        weights.append(w)
        biases.append(b)
    return weights, biases


def mlp_reference(x, weights, biases, *, sigmoid: bool):
    """Pure-JAX f32 reference for correctness checking."""
    h = x
    for i, (w, b) in enumerate(zip(weights, biases)):
        h = h @ w + b
        if i < len(weights) - 1:
            h = jnp.maximum(h, 0.0)
    if sigmoid:
        h = jax.nn.sigmoid(h)
    return h


if __name__ == "__main__":
    # Small shapes consistent with the module's forward: X is (batch, input_dim)
    batch = 32
    input_dim = 16
    hidden_dim = 32
    output_dim = 8
    num_layers = 3
    use_sigmoid = True  # inference mode (module not in training)

    key = jax.random.PRNGKey(0)
    key, kx = jax.random.split(key)
    x = jax.random.normal(kx, (batch, input_dim), jnp.float32)

    weights, biases = init_mlp_params(key, input_dim, hidden_dim, output_dim, num_layers)

    # batch_tile=16 exercises a 2-step batch grid at this small demo size
    # (production sizes auto-pick ~512-row tiles with >= 2 steps).
    out = mlp_forward(x, weights, biases, sigmoid=use_sigmoid, batch_tile=16)
    out = jax.block_until_ready(out)

    ref = mlp_reference(x, weights, biases, sigmoid=use_sigmoid)
    assert out.shape == (batch, output_dim), out.shape
    max_err = float(jnp.max(jnp.abs(out.astype(jnp.float32) - ref)))
    # bf16 MXU inputs + approx reciprocal + bf16 output -> tolerance ~2e-2
    assert max_err < 2e-2, f"max abs err = {max_err}"

    print("KERNEL_OK")
</pallas_src>

<mosaic_0001>
module attributes {stable_mosaic.version = 11 : i64} {
  func.func @_mlp_kernel(%arg0: i32, %arg1: memref<16x128xf32, #tpu.memory_space<vmem>>, %arg2: memref<128x128xbf16, #tpu.memory_space<vmem>>, %arg3: memref<1x128xf32, #tpu.memory_space<vmem>>, %arg4: memref<128x128xbf16, #tpu.memory_space<vmem>>, %arg5: memref<1x128xf32, #tpu.memory_space<vmem>>, %arg6: memref<128x128xbf16, #tpu.memory_space<vmem>>, %arg7: memref<1x128xf32, #tpu.memory_space<vmem>>, %arg8: memref<16x128xbf16, #tpu.memory_space<vmem>>) attributes {dimension_semantics = [#tpu.dimension_semantics<parallel>], iteration_bounds = array<i64: 2>, scalar_prefetch = 0 : i64, scratch_operands = 0 : i64, tpu.core_type = #tpu.core_type<tc>, window_params = [{transform_indices = @transform_0, window_bounds = array<i64: 16, 128>}, {pipeline_mode = #tpu.pipeline_mode<synchronous>, transform_indices = @transform_1, window_bounds = array<i64: 128, 128>}, {pipeline_mode = #tpu.pipeline_mode<synchronous>, transform_indices = @transform_2, window_bounds = array<i64: 1, 128>}, {pipeline_mode = #tpu.pipeline_mode<synchronous>, transform_indices = @transform_3, window_bounds = array<i64: 128, 128>}, {pipeline_mode = #tpu.pipeline_mode<synchronous>, transform_indices = @transform_4, window_bounds = array<i64: 1, 128>}, {pipeline_mode = #tpu.pipeline_mode<synchronous>, transform_indices = @transform_5, window_bounds = array<i64: 128, 128>}, {pipeline_mode = #tpu.pipeline_mode<synchronous>, transform_indices = @transform_6, window_bounds = array<i64: 1, 128>}, {transform_indices = @transform_7, window_bounds = array<i64: 16, 128>}]} {
    %c0 = arith.constant 0 : index
    %c0_0 = arith.constant 0 : index
    %0 = vector.load %arg1[%c0, %c0_0] : memref<16x128xf32, #tpu.memory_space<vmem>>, vector<16x128xf32>
    %1 = arith.truncf %0 : vector<16x128xf32> to vector<16x128xbf16>
    %c0_1 = arith.constant 0 : index
    %c0_2 = arith.constant 0 : index
    %2 = vector.load %arg2[%c0_1, %c0_2] : memref<128x128xbf16, #tpu.memory_space<vmem>>, vector<128x128xbf16>
    %cst = arith.constant dense<0.000000e+00> : vector<16x128xf32>
    %3 = tpu.matmul %1, %2, %cst {dimension_numbers = #tpu.dot_dimension_numbers<[1], [0], [0], [1], [0, 0, 1, 1], [], []>} : vector<16x128xbf16>, vector<128x128xbf16>, vector<16x128xf32> -> vector<16x128xf32>
    %c0_3 = arith.constant 0 : index
    %c0_4 = arith.constant 0 : index
    %4 = vector.load %arg3[%c0_3, %c0_4] : memref<1x128xf32, #tpu.memory_space<vmem>>, vector<1x128xf32>
    %5 = vector.broadcast %4 : vector<1x128xf32> to vector<16x128xf32>
    %6 = arith.addf %3, %5 : vector<16x128xf32>
    %cst_5 = arith.constant 0.000000e+00 : f32
    %7 = vector.broadcast %cst_5 : f32 to vector<16x128xf32>
    %8 = arith.maximumf %6, %7 : vector<16x128xf32>
    %9 = arith.truncf %8 : vector<16x128xf32> to vector<16x128xbf16>
    %c0_6 = arith.constant 0 : index
    %c0_7 = arith.constant 0 : index
    %10 = vector.load %arg4[%c0_6, %c0_7] : memref<128x128xbf16, #tpu.memory_space<vmem>>, vector<128x128xbf16>
    %cst_8 = arith.constant dense<0.000000e+00> : vector<16x128xf32>
    %11 = tpu.matmul %9, %10, %cst_8 {dimension_numbers = #tpu.dot_dimension_numbers<[1], [0], [0], [1], [0, 0, 1, 1], [], []>} : vector<16x128xbf16>, vector<128x128xbf16>, vector<16x128xf32> -> vector<16x128xf32>
    %c0_9 = arith.constant 0 : index
    %c0_10 = arith.constant 0 : index
    %12 = vector.load %arg5[%c0_9, %c0_10] : memref<1x128xf32, #tpu.memory_space<vmem>>, vector<1x128xf32>
    %13 = vector.broadcast %12 : vector<1x128xf32> to vector<16x128xf32>
    %14 = arith.addf %11, %13 : vector<16x128xf32>
    %cst_11 = arith.constant 0.000000e+00 : f32
    %15 = vector.broadcast %cst_11 : f32 to vector<16x128xf32>
    %16 = arith.maximumf %14, %15 : vector<16x128xf32>
    %17 = arith.truncf %16 : vector<16x128xf32> to vector<16x128xbf16>
    %c0_12 = arith.constant 0 : index
    %c0_13 = arith.constant 0 : index
    %18 = vector.load %arg6[%c0_12, %c0_13] : memref<128x128xbf16, #tpu.memory_space<vmem>>, vector<128x128xbf16>
    %cst_14 = arith.constant dense<0.000000e+00> : vector<16x128xf32>
    %19 = tpu.matmul %17, %18, %cst_14 {dimension_numbers = #tpu.dot_dimension_numbers<[1], [0], [0], [1], [0, 0, 1, 1], [], []>} : vector<16x128xbf16>, vector<128x128xbf16>, vector<16x128xf32> -> vector<16x128xf32>
    %c0_15 = arith.constant 0 : index
    %c0_16 = arith.constant 0 : index
    %20 = vector.load %arg7[%c0_15, %c0_16] : memref<1x128xf32, #tpu.memory_space<vmem>>, vector<1x128xf32>
    %21 = vector.broadcast %20 : vector<1x128xf32> to vector<16x128xf32>
    %22 = arith.addf %19, %21 : vector<16x128xf32>
    %cst_17 = arith.constant -3.000000e+01 : f32
    %cst_18 = arith.constant 3.000000e+01 : f32
    %23 = vector.broadcast %cst_17 : f32 to vector<16x128xf32>
    %24 = arith.maximumf %23, %22 : vector<16x128xf32>
    %25 = vector.broadcast %cst_18 : f32 to vector<16x128xf32>
    %26 = arith.minimumf %25, %24 : vector<16x128xf32>
    %cst_19 = arith.constant 0.000000e+00 : f32
    %27 = vector.broadcast %cst_19 : f32 to vector<16x128xf32>
    %28 = arith.subf %27, %26 : vector<16x128xf32>
    %29 = math.exp %28 : vector<16x128xf32>
    %cst_20 = arith.constant 1.000000e+00 : f32
    %30 = vector.broadcast %cst_20 : f32 to vector<16x128xf32>
    %31 = arith.addf %30, %29 : vector<16x128xf32>
    %32 = tpu.reciprocal %31 {approx = true} : vector<16x128xf32> -> vector<16x128xf32>
    %33 = arith.truncf %32 : vector<16x128xf32> to vector<16x128xbf16>
    %c0_21 = arith.constant 0 : index
    %c0_22 = arith.constant 0 : index
    %34 = vector.load %arg8[%c0_21, %c0_22] : memref<16x128xbf16, #tpu.memory_space<vmem>>, vector<16x128xbf16>
    tpu.vector_store %arg8[%c0_21, %c0_22], %33 {strides = array<i32>} : memref<16x128xbf16, #tpu.memory_space<vmem>>, vector<16x128xbf16>,
    return
  }
  func.func @transform_0(%arg0: i32) -> (i32, i32) {
    %c0_i32 = arith.constant 0 : i32
    %c0_i32_0 = arith.constant 0 : i32
    return %arg0, %c0_i32 : i32, i32
  }
  func.func @transform_1(%arg0: i32) -> (i32, i32) {
    %c0_i32 = arith.constant 0 : i32
    %c0_i32_0 = arith.constant 0 : i32
    %c0_i32_1 = arith.constant 0 : i32
    return %c0_i32, %c0_i32_0 : i32, i32
  }
  func.func @transform_2(%arg0: i32) -> (i32, i32) {
    %c0_i32 = arith.constant 0 : i32
    %c0_i32_0 = arith.constant 0 : i32
    %c0_i32_1 = arith.constant 0 : i32
    return %c0_i32, %c0_i32_0 : i32, i32
  }
  func.func @transform_3(%arg0: i32) -> (i32, i32) {
    %c0_i32 = arith.constant 0 : i32
    %c0_i32_0 = arith.constant 0 : i32
    %c0_i32_1 = arith.constant 0 : i32
    return %c0_i32, %c0_i32_0 : i32, i32
  }
  func.func @transform_4(%arg0: i32) -> (i32, i32) {
    %c0_i32 = arith.constant 0 : i32
    %c0_i32_0 = arith.constant 0 : i32
    %c0_i32_1 = arith.constant 0 : i32
    return %c0_i32, %c0_i32_0 : i32, i32
  }
  func.func @transform_5(%arg0: i32) -> (i32, i32) {
    %c0_i32 = arith.constant 0 : i32
    %c0_i32_0 = arith.constant 0 : i32
    %c0_i32_1 = arith.constant 0 : i32
    return %c0_i32, %c0_i32_0 : i32, i32
  }
  func.func @transform_6(%arg0: i32) -> (i32, i32) {
    %c0_i32 = arith.constant 0 : i32
    %c0_i32_0 = arith.constant 0 : i32
    %c0_i32_1 = arith.constant 0 : i32
    return %c0_i32, %c0_i32_0 : i32, i32
  }
  func.func @transform_7(%arg0: i32) -> (i32, i32) {
    %c0_i32 = arith.constant 0 : i32
    %c0_i32_0 = arith.constant 0 : i32
    return %arg0, %c0_i32 : i32, i32
  }
}

</mosaic_0001>

<bundles_post_ra>
// kernel: tpu_custom_call.1
= control target key start
LH: loop header
LB: loop body
LE: loop exit
PB: predicated region body
PF: predicated region fallthrough
CT: control target
= control target key end

     0   :  { %s1404_s0 = inlined_call_operand.hbm [shape: f32[32,128], index: 0, kind: input, shape index: {}]   ;;  %s1405_s1 = inlined_call_operand.hbm [shape: bf16[128,128], index: 1, kind: input, shape index: {}]   ;;  %s1406_s2 = inlined_call_operand.vmem [shape: f32[1,128], index: 2, kind: input, shape index: {}]   ;;  %s1407_s3 = inlined_call_operand.hbm [shape: bf16[128,128], index: 3, kind: input, shape index: {}]   ;;  %s1408_s4 = inlined_call_operand.vmem [shape: f32[1,128], index: 4, kind: input, shape index: {}]   ;;  %s1409_s5 = inlined_call_operand.hbm [shape: bf16[128,128], index: 5, kind: input, shape index: {}]   ;;  %s1410_s6 = inlined_call_operand.vmem [shape: f32[1,128], index: 6, kind: input, shape index: {}]   ;;  %s1411_s7 = inlined_call_operand.hbm [shape: bf16[32,128], index: 7, kind: output, shape index: {}]  }
   0x1   :  { %1412 = sst [smem:[#allocation15_spill]] %s1405_s1 }
   0x2   :  { %12 = vsyncpa [#allocation3], 0 }
   0x3   :  { %14 = vsyncpa [#allocation3 + $0x1], 0 }
   0x4   :  { %15 = vsyncpa [#allocation6], 0 }
   0x5   :  { %16 = vsyncpa [#allocation9], 0 }
   0x6   :  { %17 = vsyncpa [#allocation4], 0 }
   0x7   :  { %19 = vsyncpa [#allocation4 + $0x1], 0  ;;  %s1230_s24 = smov 0   ;;  %s1232_s25 = smov 0  }
   0x8   :  { %s1234_s26 = smov 0   ;;  %s1236_s27 = smov 0  }
   0x9 LB: > { %s1251_s28 = sadd.s32 4294967295, %s1179_s27   ;;  %s742_s29 = sadd.s32 4294967294, %s1179_s27   ;;  %s1179_s27 = sphi %s1236_s27, %s1424_s27   ;;  %s1175_s26 = sphi %s1234_s26, %s1423_s26   ;;  %s1171_s25 = sphi %s1232_s25, %s1422_s25   ;;  %s1167_s24 = sphi %s1230_s24, %s1421_s24  }
   0xa   : > { %p45_p0 = scmp.ne.s32.totalorder %s1171_s25, %s1167_s24  ;;  %p46_p1 = scmp.eq.s32.totalorder %s1251_s28, 0 }
   0xb   : > { %p195_p2 = scmp.eq.s32.totalorder %s1251_s28, 1  ;;  %p201_p3 = scmp.eq.s32.totalorder %s742_s29, 1 }
   0xc   : > { %p1260_p4 = por %p46_p1, %p45_p0  ;;  %p743_p5 = scmp.ge.s32.totalorder %s1179_s27, 1 }
   0xd   : > { %p1265_p6 = por %p201_p3, %p45_p0  ;;  %p208_p7 = scmp.lt.s32.totalorder %s1179_s27, 3 }
   0xe   : > { %s1415_s1 = sld [smem:[#allocation15_spill]]  ;;  %s1181_s13 = smov [#allocation5]  }
   0xf   : > { %p1273_p8 = pnand %p743_p5, %p208_p7  ;;  %s221_s14 = sshll.u32 %s1181_s13, 4  ;;  %s222_s14 = int_to_ptr.vmem [resolvable:$true] %s221_s14 }
  0x10   : > { %s236_s18 = sshll.u32 %s1407_s3, 4  ;;  %s1182_s19 = smov 64   ;;  %s237_s18 = int_to_ptr.hbm [resolvable:$true] %s236_s18 }
  0x11   : > { %p907_p9 = pneg %p1273_p8  ;;  %s1183_s20 = smov 4  }
  0x12   : > { %s1184_s21 = smov [#allocation7]   ;;  %s253_s9 = sshll.u32 %s1409_s5, 4  ;;  %s254_s9 = int_to_ptr.hbm [resolvable:$true] %s253_s9 }
  0x13   : > { %p1281_p10 = pnand %p907_p9, %p46_p1  ;;  %s238_s22 = sshll.u32 %s1184_s21, 4  ;;  %s239_s22 = int_to_ptr.vmem [resolvable:$true] %s238_s22 }
  0x14   : > { %s219_s11 = sshll.u32 %s1415_s1, 4  ;;  %s1185_s10 = smov [#allocation8]   ;;  %s220_s11 = int_to_ptr.hbm [resolvable:$true] %s219_s11 }
  0x15   : > { %910 = dma.hbm_to_vmem [thread:$0]  (!%p1281_p10), %s220_s11, 1024, %s222_s14, [#allocation6], %s1182_s19, %s1182_s19, %s1183_s20  }
  0x16   : > { %913 = dma.hbm_to_vmem [thread:$0]  (!%p1281_p10), %s237_s18, 1024, %s239_s22, [#allocation6], %s1182_s19, %s1182_s19, %s1183_s20  }
  0x17   : > { %s255_s13 = sshll.u32 %s1185_s10, 4  ;;  %s1297_s11 = sadd.s32 1, %s1179_s27   ;;  %s256_s13 = int_to_ptr.vmem [resolvable:$true] %s255_s13 }
  0x18   : > { %916 = dma.hbm_to_vmem [thread:$0]  (!%p1281_p10), %s254_s9, 1024, %s256_s13, [#allocation9], %s1182_s19, %s1182_s19, %s1183_s20  }
  0x19   : > { %s29_s14 = ssub.s32 %s1179_s27, %s1297_s11  ;;  %s32_s16 = sadd.s32 1, %s1175_s26 }
  0x1a   : > { %p30_p12 = scmp.eq.s32.totalorder %s29_s14, 0  ;;  %p39_p13 = scmp.ne.s32.totalorder %s1175_s26, %s1171_s25 }
  0x1b   : > { %p40_p0 = scmp.eq.s32.totalorder %s1179_s27, 0  ;;  %p928_p3 = scmp.lt.s32.totalorder %s1179_s27, 2 }
  0x1c   : > { %s1309_s17 = scalar_select %p30_p12, %s1175_s26, %s32_s16  }
  0x1d   : > { %p41_p5 = por %p40_p0, %p39_p13  ;;  %p1313_p7 = por %p195_p2, %p39_p13 }
  0x1e   : > { %s272_s21 = sand.u32 1, %s1175_s26   ;;  %s860_s22 = sshll.u32 %s1179_s27, 4 }
  0x1f   : > { %s748_s15 = sshll.u32 %s272_s21, 4  ;;  %s281_s20 = scalar_lea.hbm %s1404_s0, %s860_s22 }
  0x20   : > { %s282_s29 = sshll.u32 %s281_s20, 4  ;;  %s276_s9 = scalar_lea.vmem [#allocation2], %s748_s15  ;;  %s283_s29 = int_to_ptr.hbm [resolvable:$true] %s282_s29 }
  0x21   : > { %s284_s10 = sshll.u32 %s276_s9, 4  ;;  %p1324_p9 = pnand %p928_p3, %p41_p5  ;;  %s285_s10 = int_to_ptr.vmem [resolvable:$true] %s284_s10 }
  0x22   : > { %s273_s14 = scalar_lea.sflag [#allocation3], %s272_s21  ;;  %s1075_s16 = sshra.s32 %s283_s29, 4  ;;  %s1076_s16 = int_to_ptr.hbm [resolvable:$true] %s1075_s16 }
  0x23   : > { %s1077_s1 = scalar_lea.hbm %s1076_s16, 16  ;;  %p1079_p10 = pneg %p1324_p9 }
  0x24   : > { %p1078_p2 = scmp.ne.s32.totalorder %s1076_s16, %s1077_s1  ;;  %s1082_s23 = scalar_lea.hbm %s1404_s0, 32 }
  0x25   : > { %p1083_p0 = scmp.lt.s32.totalorder %s1076_s16, %s1404_s0  ;;  %p1084_p3 = scmp.lt.s32.totalorder %s1082_s23, %s1077_s1 }
  0x26   : > { %p1080_p12 = pnand %p1079_p10, %p1078_p2 }
  0x27   : > { %p1085_p5 = por %p1084_p3, %p1083_p0 }
  0x28   : > { %p1081_p13 = pneg %p1080_p12 }
  0x2a   : > { %p1086_p11 = pnand %p1085_p5, %p1081_p13 }
  0x2c   : > { %1089 = shalt.err (!%p1086_p11)
}
  0x2d   : > { %s1186_s21 = smov 128   ;;  %s1187_s9 = smov 8  }
  0x2e   : > { %920 = dma.hbm_to_vmem [thread:$0]  (!%p1324_p9), %s283_s29, 256, %s285_s10, %s273_s14, %s1186_s21, %s1186_s21, %s1187_s9  }
  0x2f   : > { %296 = sbr.rel (%p1273_p8) target bundleno = 539 (0x21b), region = 48  ;;  %s1341_s22 = sand.u32 (!%p1273_p8), 1, %s1171_s25  }
  0x30   : > { %s752_s15 = sshll.u32 (!%p1273_p8), %s1341_s22, 4  ;;  %s299_s16 = scalar_lea.sflag (!%p1273_p8), [#allocation3], %s1341_s22 }
  0x31   : > { %s1345_s1 = scalar_lea.vmem (!%p1273_p8), [#allocation2], %s752_s15 }
  0x34   : > { %1150 = dma.done.wait (%p1260_p4), %s299_s16, 256  }
  0x35   : > { %1152 = vsyncadd (%p1260_p4), %s299_s16, 4294967040 }
  0x36   : > { %1154 = dma.done.wait (%p46_p1), [#allocation6], 2048  }
  0x37   : > { %1156 = vsyncadd (%p46_p1), [#allocation6], 4294965248 }
  0x38   : > { %1158 = dma.done.wait (%p46_p1), [#allocation9], 1024  }
  0x39   : > { %1160 = vsyncadd (%p46_p1), [#allocation9], 4294966272  ;;  %v868_v0 = vld [vmem:[#allocation5 + $0x38] sm:$0xff]  ;;  %v867_v1 = vld [vmem:[#allocation5 + $0x30] sm:$0xff]  ;;  %s756_s23 = sshll.u32 %s1341_s22, 3  ;;  %s885_s19 = sshll.u32 %s1251_s28, 3 }
  0x3a   : > { %422 = vmatpush.bf16.msra.mxu0 %v868_v0  ;;  %v876_v2 = vld [vmem:[#allocation7 + $0x38] sm:$0xff]  ;;  %v875_v3 = vld [vmem:[#allocation7 + $0x30] sm:$0xff]  ;;  %v866_v4 = vld [vmem:[#allocation5 + $0x28] sm:$0xff]  ;;  %s636_s9 = scalar_lea.hbm %s1411_s7, %s885_s19  ;;  %s348_s15 = scalar_lea.vmem [#allocation10], %s756_s23 }
  0x3b   : > { %507 = vmatpush.bf16.msra.mxu1 %v876_v2  ;;  %v874_v5 = vld [vmem:[#allocation7 + $0x28] sm:$0xff]  ;;  %v865_v6 = vld [vmem:[#allocation5 + $0x20] sm:$0xff]  ;;  %v864_v8 = vld [vmem:[#allocation5 + $0x18] sm:$0xff]  ;;  %s637_s16 = sshll.u32 %s348_s15, 4  ;;  %s625_s30 = scalar_lea.sflag [#allocation4], %s1341_s22  ;;  %s638_s16 = int_to_ptr.vmem [resolvable:$true] %s637_s16 }
  0x3c   : > { %v873_v7 = vld [vmem:[#allocation7 + $0x20] sm:$0xff]  ;;  %v863_v9 = vld [vmem:[#allocation5 + $0x10] sm:$0xff]  ;;  %v862_v10 = vld [vmem:[#allocation5 + $0x8] sm:$0xff]  ;;  %s1125_s13 = scalar_lea.hbm %s1411_s7, 16 }
  0x3d   : > { %v861_v11 = vld [vmem:[#allocation5] sm:$0xff]  ;;  %v352_v13 = vld [vmem:[%s1345_s1 + $0x8] sm:$0xff]  ;;  %v871_v16 = vld [vmem:[#allocation7 + $0x10] sm:$0xff] }
  0x3e   : > { %423 = vmatpush.bf16.msra.mxu0 %v867_v1  ;;  %v351_v12 = vld [vmem:[%s1345_s1] sm:$0xff]  ;;  %v872_v15 = vld [vmem:[#allocation7 + $0x18] sm:$0xff]  ;;  %v870_v17 = vld [vmem:[#allocation7 + $0x8] sm:$0xff]  ;;  %s639_s1 = sshll.u32 %s636_s9, 4  ;;  %s640_s1 = int_to_ptr.hbm [resolvable:$true] %s639_s1 }
  0x3f   : > { %508 = vmatpush.bf16.msra.mxu1 %v875_v3  ;;  %v353_v14 = vpack.c.bf16 %v352_v13, %v351_v12  ;;  %v869_v18 = vld [vmem:[#allocation7] sm:$0xff]  ;;  %v884_v19 = vld [vmem:[#allocation8 + $0x38] sm:$0xff]  ;;  %v883_v20 = vld [vmem:[#allocation8 + $0x30] sm:$0xff]  ;;  %s1119_s12 = sshra.s32 %s640_s1, 4  ;;  %s1120_s12 = int_to_ptr.hbm [resolvable:$true] %s1119_s12 }
  0x40   : > { %592 = vmatpush.bf16.msra.mxu2 %v884_v19  ;;  %v882_v21 = vld [vmem:[#allocation8 + $0x28] sm:$0xff]  ;;  %v881_v22 = vld [vmem:[#allocation8 + $0x20] sm:$0xff]  ;;  %v880_v31 = vld [vmem:[#allocation8 + $0x18] sm:$0xff]  ;;  %s1121_s28 = scalar_lea.hbm %s1120_s12, 8  ;;  %p1126_p11 = scmp.lt.s32.totalorder %s1120_s12, %s1411_s7 }
  0x41   : > { %v974_v24 = vld [vmem:[%s1406_s2] ss:$0 sm:$0xff]  ;;  %v879_v32 = vld [vmem:[#allocation8 + $0x10] sm:$0xff]  ;;  %v878_v33 = vld [vmem:[#allocation8 + $0x8] sm:$0xff]  ;;  %p1122_p1 = scmp.ne.s32.totalorder %s1120_s12, %s1121_s28  ;;  %p1127_p9 = scmp.lt.s32.totalorder %s1125_s13, %s1121_s28 }
  0x42   : > { %424 = vmatpush.bf16.msra.mxu0 %v866_v4  ;;  %v877_v34 = vld [vmem:[#allocation8] sm:$0xff] }
  0x43   : > { %509 = vmatpush.bf16.msra.mxu1 %v874_v5  ;;  %v975_v36 = vld [vmem:[%s1408_s4] ss:$0 sm:$0xff]  ;;  %p1123_p4 = pnand %p1122_p1, %p1313_p7  ;;  %p1128_p2 = por %p1127_p9, %p1126_p11 }
  0x44   : > { %593 = vmatpush.bf16.msra.mxu2 %v883_v20  ;;  %v976_v43 = vld [vmem:[%s1410_s6] ss:$0 sm:$0xff] }
  0x45   : > { %p1124_p8 = pneg %p1123_p4 }
  0x46   : > { %425 = vmatpush.bf16.msra.mxu0 %v865_v6 }
  0x47   : > { %510 = vmatpush.bf16.msra.mxu1 %v873_v7  ;;  %p1129_p10 = pnand %p1128_p2, %p1124_p8 }
  0x48   : > { %594 = vmatpush.bf16.msra.mxu2 %v882_v21 }
  0x4a   : > { %426 = vmatpush.bf16.msra.mxu0 %v864_v8 }
  0x4b   : > { %511 = vmatpush.bf16.msra.mxu1 %v872_v15 }
  0x4c   : > { %595 = vmatpush.bf16.msra.mxu2 %v881_v22 }
  0x4e   : > { %427 = vmatpush.bf16.msra.mxu0 %v863_v9 }
  0x4f   : > { %512 = vmatpush.bf16.msra.mxu1 %v871_v16 }
  0x50   : > { %596 = vmatpush.bf16.msra.mxu2 %v880_v31 }
  0x52   : > { %428 = vmatpush.bf16.msra.mxu0 %v862_v10 }
  0x53   : > { %513 = vmatpush.bf16.msra.mxu1 %v870_v17 }
  0x54   : > { %597 = vmatpush.bf16.msra.mxu2 %v879_v32 }
  0x56   : > { %429 = vmatpush.bf16.msra.mxu0 %v861_v11 }
  0x57   : > { %514 = vmatpush.bf16.msra.mxu1 %v869_v18 }
  0x58   : > { %598 = vmatpush.bf16.msra.mxu2 %v878_v33 }
  0x59   : > { %430 = vmatmul.bf16.vlgmr.msra.gmra.mxu0 %v353_v14 }
  0x5c   : > { %599 = vmatpush.bf16.msra.mxu2 %v877_v34 }
  0xd6   : > { %v431_v23 = vpop.f32.mrf.mxu0 }
  0xd7   : > { %v432_v25 = vadd.f32 %v974_v24, %v431_v23 }
  0xd9   : > { %v436_v28 = vmax.f32 %v432_v25, 0.0 }
  0xde   : > { %v433_v26 = vpop.f32.mrf.mxu0 }
  0xdf   : > { %v434_v27 = vadd.f32 %v974_v24, %v433_v26 }
  0xe1   : > { %v437_v29 = vmax.f32 %v434_v27, 0.0 }
  0xe3   : > { %v438_v30 = vpack.c.bf16 %v437_v29, %v436_v28 }
  0xe5   : > { %515 = vmatmul.bf16.vlgmr.msra.gmra.mxu1 %v438_v30 }
 0x162   : > { %v516_v35 = vpop.f32.mrf.mxu1 }
 0x163   : > { %v517_v37 = vadd.f32 %v975_v36, %v516_v35 }
 0x165   : > { %v521_v40 = vmax.f32 %v517_v37, 0.0 }
 0x16a   : > { %v518_v38 = vpop.f32.mrf.mxu1 }
 0x16b   : > { %v519_v39 = vadd.f32 %v975_v36, %v518_v38 }
 0x16d   : > { %v522_v41 = vmax.f32 %v519_v39, 0.0 }
 0x16f   : > { %v523_v42 = vpack.c.bf16 %v522_v41, %v521_v40 }
 0x171   : > { %600 = vmatmul.bf16.vlgmr.msra.gmra.mxu2 %v523_v42 }
 0x1f4   : > { %v601_v44 = vpop.f32.mrf.mxu2 }
 0x1f5   : > { %v602_v45 = vadd.f32 %v976_v43, %v601_v44 }
 0x1f7   : > { %v853_v46 = vclamps-f32 %v602_v45, 30.0 }
 0x1f9   : > { %v610_v47 = vsub.f32 0.0, %v853_v46 }
 0x1fb   : > { %v612_v48 = vmul.f32 1.442695, %v610_v47 }
 0x1fc   : > { %v603_v49 = vpop.f32.mrf.mxu2 }
 0x1fd   : > { %v604_v50 = vadd.f32 %v976_v43, %v603_v49  ;;  %977 = vpow2.f32 %v612_v48 }
 0x1ff   : > { %v854_v51 = vclamps-f32 %v604_v50, 30.0 }
 0x201   : > { %v611_v52 = vsub.f32 0.0, %v854_v51 }
 0x203   : > { %v614_v53 = vmul.f32 1.442695, %v611_v52  ;;  %v978_v54 = vpop.eup %977 }
 0x204   : > { %v616_v55 = vadd.f32 1.0, %v978_v54 }
 0x205   : > { %979 = vpow2.f32 %v614_v53 }
 0x206   : > { %981 = vrcp.f32 %v616_v55 }
 0x20b   : > { %v980_v56 = vpop.eup %979 }
 0x20c   : > { %v617_v57 = vadd.f32 1.0, %v980_v56  ;;  %v982_v58 = vpop.eup %981 }
 0x20e   : > { %983 = vrcp.f32 %v617_v57 }
 0x214   : > { %v984_v59 = vpop.eup %983 }
 0x215   : > { %v889_v60 = vpack.c.bf16 %v984_v59, %v982_v58 }
 0x217   : > { %890 = vst [vmem:[%s348_s15] sm:$0xff] %v889_v60  }
 0x218   : > { %1132 = shalt.err (!%p1129_p10)
}
 0x219   : > { %s1188_s22 = smov 64   ;;  %s1189_s19 = smov 4  }
 0x21a   : > { %905 = dma.vmem_to_hbm [thread:$0]  (%p1313_p7), %s638_s16, 128, %s640_s1, %s625_s30, %s1188_s22, %s1188_s22, %s1189_s19  }
 0x21b PF: > { %s654_s20 = sand.u32 1, %s1167_s24   ;;  %p1420_p12 = scmp.ge.s32.totalorder %s1179_s27, 2 }
 0x21c   : > { %s655_s21 = scalar_lea.sflag [#allocation4], %s654_s20 }
 0x21d   : > { %p922_p13 = pnand %p1420_p12, %p1265_p6 }
 0x21f   : > { %p923_p0 = pneg %p922_p13 }
 0x221   : > { %1162 = dma.done.wait (%p923_p0), %s655_s21, 128  }
 0x222   : > { %1164 = vsyncadd (%p923_p0), %s655_s21, 4294967168  ;;  %p22_p3 = scmp.ge.s32.totalorder %s1297_s11, 4   ;;  %s1421_s24 = smov %s1171_s25 }
 0x223   : > { %s1422_s25 = smov %s1175_s26  ;;  %s1423_s26 = smov %s1309_s17 }
 0x224   : > { %s1424_s27 = smov %s1297_s11  ;;  %24 = sbr.rel (!%p22_p3) target bundleno = 9 (0x9), region = 105 }
 0x229   :  { %661 = vsyncpa [#allocation3], 1 }
 0x22a   :  { %663 = vsyncpa [#allocation3 + $0x1], 1 }
 0x22b   :  { %664 = vsyncpa [#allocation6], 1 }
 0x22c   :  { %665 = vsyncpa [#allocation9], 1 }
 0x22d   :  { %666 = vsyncpa [#allocation4], 1 }
 0x22e   :  { %668 = vsyncpa [#allocation4 + $0x1], 1 }

</bundles_post_ra>
